<compile_context>
chip_gen: v6e
topology: v6e:2x2x1
jax: 0.10.0
libtpu: 0.0.40
codegen_flags: <defaults>
</compile_context>

<pallas_src>
import functools

import numpy as np
import jax
import jax.numpy as jnp
from jax.experimental import pallas as pl
from jax.experimental.pallas import tpu as pltpu

EMBEDDING_DIM = 32
HIDDEN_DIM = 4 * EMBEDDING_DIM        # 128
LANE = 128
PACK = LANE // EMBEDDING_DIM          # 4 tokens per lane-dense slab row

_SQRT_2_OVER_PI = 0.7978845608028654
_GELU_C = 0.044715
_INV_SQRT2 = 0.7071067811865476


def _gelu_tanh(h):
    # tanh-approx GELU: 0.5*h*(1 + tanh(sqrt(2/pi)*(h + 0.044715*h^3))).
    # One EUP tanh + a handful of VPU ops; ~1e-3 from nn.GELU()'s exact erf.
    return 0.5 * h * (1.0 + jnp.tanh(_SQRT_2_OVER_PI * (h + _GELU_C * (h * h * h))))


def _gelu_erf(h):
    # Exact GELU (erf form) — reference only.
    return 0.5 * h * (1.0 + jax.lax.erf(h * _INV_SQRT2))


def _mlp_kernel(elem_dtype, x_ref, w1_ref, b1_ref, w2_ref, b2_ref, o_ref):
    # x_ref:  (tm, 128)   f32    4 tokens per row, lane-dense (cast in-kernel)
    # w1_ref: (128, 512)  bf16   block_diag(W1 x4), W1: (32, 128)   (resident)
    # b1_ref: (1, 512)    f32    tile(b1, 4)
    # w2_ref: (512, 128)  bf16   block_diag(W2 x4), W2: (128, 32)   (resident)
    # b2_ref: (1, 128)    f32    tile(b2, 4)
    # o_ref:  (tm, 128)   bf16   lane-dense output slab
    x = x_ref[...].astype(jnp.bfloat16)          # in-kernel VPU cast (VALU has slack)

    # fc_1 on the MXU, bf16 operands, f32 accumulation.
    h = jnp.dot(x, w1_ref[...], preferred_element_type=jnp.float32) + b1_ref[...]

    # GELU: bf16 on v6e/v7x (packed VPU/EUP paths), f32 on v5e.
    g = _gelu_tanh(h.astype(elem_dtype))

    # proj on the MXU, bf16 operands, f32 accumulation.
    y = jnp.dot(g.astype(jnp.bfloat16), w2_ref[...],
                preferred_element_type=jnp.float32) + b2_ref[...]
    o_ref[...] = y.astype(o_ref.dtype)


def _round_up(n, m):
    return ((n + m - 1) // m) * m


def _default_elem_dtype():
    # bf16 elementwise only where VPU/EUP have packed-bf16 paths (v6e/v7x);
    # v5e and older are f32-only on those units.
    try:
        kind = jax.devices()[0].device_kind.lower()
    except Exception:
        return jnp.float32
    return jnp.bfloat16 if ("v6" in kind or "v7" in kind) else jnp.float32


def prepare_params(w1, b1, w2, b2):
    """One-time expansion to the 4-way block-diagonal / bf16 form the kernel
    consumes.  Hoisted out of the per-call path (review item)."""
    eye = jnp.eye(PACK, dtype=jnp.float32)
    w1_bd = jnp.kron(eye, w1.astype(jnp.float32)).astype(jnp.bfloat16)   # (128, 512)
    w2_bd = jnp.kron(eye, w2.astype(jnp.float32)).astype(jnp.bfloat16)   # (512, 128)
    b1_bd = jnp.tile(b1.reshape(1, HIDDEN_DIM), (1, PACK)).astype(jnp.float32)
    b2_bd = jnp.tile(b2.reshape(1, EMBEDDING_DIM), (1, PACK)).astype(jnp.float32)
    return w1_bd, b1_bd, w2_bd, b2_bd


@functools.partial(jax.jit,
                   static_argnames=("tm_tokens", "elem_dtype", "out_dtype"))
def _mlp_forward(x, w1_bd, b1_bd, w2_bd, b2_bd, *, tm_tokens, elem_dtype, out_dtype):
    M, D = x.shape
    assert D == EMBEDDING_DIM and w1_bd.shape == (LANE, PACK * HIDDEN_DIM)

    # ---- lane-dense slab view: 4 tokens per 128-lane row -------------------
    m_slab = _round_up(M, PACK) // PACK
    tm_slab = max(16, (tm_tokens // PACK) // 16 * 16)     # 16-row sublane tiles
    if m_slab <= tm_slab:
        if m_slab > 32:
            # enough work for 2 steps -> both v7x TensorCores under "parallel"
            tm_slab = max(16, _round_up((m_slab + 1) // 2, 16))
        else:
            tm_slab = max(16, _round_up(m_slab, 16))
    m_slab_pad = _round_up(m_slab, tm_slab)
    m_pad = m_slab_pad * PACK

    if m_pad != M:
        x = jnp.pad(x, ((0, m_pad - M), (0, 0)))
    x_slab = x.reshape(m_slab_pad, LANE)                  # free row-major view, dtype kept

    grid = (m_slab_pad // tm_slab,)
    kernel = functools.partial(_mlp_kernel, elem_dtype)
    out_slab = pl.pallas_call(
        kernel,
        out_shape=jax.ShapeDtypeStruct((m_slab_pad, LANE), out_dtype),
        grid_spec=pltpu.PrefetchScalarGridSpec(
            num_scalar_prefetch=0,
            grid=grid,
            in_specs=[
                pl.BlockSpec((tm_slab, LANE), lambda i: (i, 0)),            # x tiles
                pl.BlockSpec((LANE, PACK * HIDDEN_DIM), lambda i: (0, 0)),  # w1_bd (resident)
                pl.BlockSpec((1, PACK * HIDDEN_DIM), lambda i: (0, 0)),     # b1_bd
                pl.BlockSpec((PACK * HIDDEN_DIM, LANE), lambda i: (0, 0)),  # w2_bd (resident)
                pl.BlockSpec((1, LANE), lambda i: (0, 0)),                  # b2_bd
            ],
            out_specs=pl.BlockSpec((tm_slab, LANE), lambda i: (i, 0)),
        ),
        compiler_params=pltpu.CompilerParams(
            dimension_semantics=("parallel",),
            vmem_limit_bytes=32 << 20,
        ),
    )(x_slab, w1_bd, b1_bd, w2_bd, b2_bd)

    return out_slab.reshape(m_pad, EMBEDDING_DIM)[:M]


def mlp_forward(x, prepared_params, *, tm_tokens=8192, elem_dtype=None,
                out_dtype=jnp.bfloat16):
    """x: [M, D] tokens; prepared_params from prepare_params().
    Returns [M, D] in out_dtype (bf16 default; pass jnp.float32 if the model
    needs f32 activations downstream, at ~1.5x store-side HBM cost)."""
    if elem_dtype is None:
        elem_dtype = _default_elem_dtype()
    w1_bd, b1_bd, w2_bd, b2_bd = prepared_params
    return _mlp_forward(x, w1_bd, b1_bd, w2_bd, b2_bd,
                        tm_tokens=int(tm_tokens),
                        elem_dtype=np.dtype(elem_dtype),
                        out_dtype=np.dtype(out_dtype))


def init_params(key, dtype=jnp.float32):
    """Mirrors the module's __init__: weights ~ N(0, 0.02), biases = 0.
    Weights stored [in_features, out_features] so the kernel computes x @ W + b."""
    k1, k2 = jax.random.split(key)
    w1 = (0.02 * jax.random.normal(k1, (EMBEDDING_DIM, HIDDEN_DIM))).astype(dtype)
    b1 = jnp.zeros((1, HIDDEN_DIM), dtype)
    w2 = (0.02 * jax.random.normal(k2, (HIDDEN_DIM, EMBEDDING_DIM))).astype(dtype)
    b2 = jnp.zeros((1, EMBEDDING_DIM), dtype)
    return w1, b1, w2, b2


def _ref_mlp_f32(x, w1, b1, w2, b2):
    """Exact f32 reference (module semantics: exact-erf GELU)."""
    h = x @ w1 + b1
    return _gelu_erf(h) @ w2 + b2


def _ref_mlp_kernel_numerics(x, w1, b1, w2, b2, elem_dtype, out_dtype):
    """Mirrors the kernel numerics: bf16 MXU operands, f32 accumulation,
    tanh GELU in elem_dtype, out_dtype output."""
    xb, w1b, w2b = (a.astype(jnp.bfloat16) for a in (x, w1, w2))
    h = jnp.dot(xb, w1b, preferred_element_type=jnp.float32) + b1
    g = _gelu_tanh(h.astype(elem_dtype))
    y = jnp.dot(g.astype(jnp.bfloat16), w2b, preferred_element_type=jnp.float32) + b2
    return y.astype(out_dtype)


if __name__ == "__main__":
    key = jax.random.PRNGKey(0)
    kx, kp = jax.random.split(key)

    batch, seq = 2, 8
    x = jax.random.normal(kx, (batch, seq, EMBEDDING_DIM), jnp.float32)
    w1, b1, w2, b2 = init_params(kp)

    elem_dtype = _default_elem_dtype()
    prepared = prepare_params(w1, b1, w2, b2)     # one-time (hoisted) expansion

    # flatten [B, T, D] -> [B*T, D] for the kernel, reshape back after
    x2d = x.reshape(-1, EMBEDDING_DIM)
    out2d = mlp_forward(x2d, prepared, elem_dtype=elem_dtype)
    out = out2d.reshape(batch, seq, EMBEDDING_DIM)
    jax.block_until_ready(out)

    # TODO(synk): kernel uses tanh-approx GELU (per perf review) instead of
    # nn.GELU()'s exact erf — ~1e-3 deviation, covered by the f32 tolerance.
    ref_match = _ref_mlp_kernel_numerics(
        x2d, w1, b1, w2, b2, np.dtype(elem_dtype), jnp.bfloat16
    ).reshape(batch, seq, EMBEDDING_DIM)
    ref_f32 = _ref_mlp_f32(x2d, w1, b1, w2, b2).reshape(batch, seq, EMBEDDING_DIM)

    out_f = out.astype(jnp.float32)
    assert jnp.allclose(out_f, ref_match.astype(jnp.float32), atol=1e-3, rtol=1e-3), \
        "mismatch vs kernel-numerics reference"
    assert jnp.allclose(out_f, ref_f32, atol=5e-3, rtol=1e-2), \
        "mismatch vs exact f32 (erf-GELU) reference"

    print("KERNEL_OK")
</pallas_src>

<mosaic_0001>
module attributes {stable_mosaic.version = 11 : i64} {
  func.func @_mlp_kernel(%arg0: i32, %arg1: memref<16x128xf32, #tpu.memory_space<vmem>>, %arg2: memref<128x512xbf16, #tpu.memory_space<vmem>>, %arg3: memref<1x512xf32, #tpu.memory_space<vmem>>, %arg4: memref<512x128xbf16, #tpu.memory_space<vmem>>, %arg5: memref<1x128xf32, #tpu.memory_space<vmem>>, %arg6: memref<16x128xbf16, #tpu.memory_space<vmem>>) attributes {dimension_semantics = [#tpu.dimension_semantics<parallel>], iteration_bounds = array<i64: 1>, scalar_prefetch = 0 : i64, scratch_operands = 0 : i64, tpu.core_type = #tpu.core_type<tc>, window_params = [{transform_indices = @transform_0, window_bounds = array<i64: 16, 128>}, {pipeline_mode = #tpu.pipeline_mode<synchronous>, transform_indices = @transform_1, window_bounds = array<i64: 128, 512>}, {pipeline_mode = #tpu.pipeline_mode<synchronous>, transform_indices = @transform_2, window_bounds = array<i64: 1, 512>}, {pipeline_mode = #tpu.pipeline_mode<synchronous>, transform_indices = @transform_3, window_bounds = array<i64: 512, 128>}, {pipeline_mode = #tpu.pipeline_mode<synchronous>, transform_indices = @transform_4, window_bounds = array<i64: 1, 128>}, {transform_indices = @transform_5, window_bounds = array<i64: 16, 128>}]} {
    %c0 = arith.constant 0 : index
    %c0_0 = arith.constant 0 : index
    %0 = vector.load %arg1[%c0, %c0_0] : memref<16x128xf32, #tpu.memory_space<vmem>>, vector<16x128xf32>
    %1 = arith.truncf %0 : vector<16x128xf32> to vector<16x128xbf16>
    %c0_1 = arith.constant 0 : index
    %c0_2 = arith.constant 0 : index
    %2 = vector.load %arg2[%c0_1, %c0_2] : memref<128x512xbf16, #tpu.memory_space<vmem>>, vector<128x512xbf16>
    %cst = arith.constant dense<0.000000e+00> : vector<16x512xf32>
    %3 = tpu.matmul %1, %2, %cst {dimension_numbers = #tpu.dot_dimension_numbers<[1], [0], [0], [1], [0, 0, 1, 1], [], []>} : vector<16x128xbf16>, vector<128x512xbf16>, vector<16x512xf32> -> vector<16x512xf32>
    %c0_3 = arith.constant 0 : index
    %c0_4 = arith.constant 0 : index
    %4 = vector.load %arg3[%c0_3, %c0_4] : memref<1x512xf32, #tpu.memory_space<vmem>>, vector<1x512xf32>
    %5 = vector.broadcast %4 : vector<1x512xf32> to vector<16x512xf32>
    %6 = arith.addf %3, %5 : vector<16x512xf32>
    %cst_5 = arith.constant 5.000000e-01 : f32
    %7 = vector.broadcast %cst_5 : f32 to vector<16x512xf32>
    %8 = arith.mulf %7, %6 : vector<16x512xf32>
    %9 = arith.mulf %6, %6 : vector<16x512xf32>
    %10 = arith.mulf %9, %6 : vector<16x512xf32>
    %cst_6 = arith.constant 4.471500e-02 : f32
    %11 = vector.broadcast %cst_6 : f32 to vector<16x512xf32>
    %12 = arith.mulf %11, %10 : vector<16x512xf32>
    %13 = arith.addf %6, %12 : vector<16x512xf32>
    %cst_7 = arith.constant 0.797884583 : f32
    %14 = vector.broadcast %cst_7 : f32 to vector<16x512xf32>
    %15 = arith.mulf %14, %13 : vector<16x512xf32>
    %16 = math.tanh %15 : vector<16x512xf32>
    %cst_8 = arith.constant 1.000000e+00 : f32
    %17 = vector.broadcast %cst_8 : f32 to vector<16x512xf32>
    %18 = arith.addf %17, %16 : vector<16x512xf32>
    %19 = arith.mulf %8, %18 : vector<16x512xf32>
    %20 = arith.truncf %19 : vector<16x512xf32> to vector<16x512xbf16>
    %c0_9 = arith.constant 0 : index
    %c0_10 = arith.constant 0 : index
    %21 = vector.load %arg4[%c0_9, %c0_10] : memref<512x128xbf16, #tpu.memory_space<vmem>>, vector<512x128xbf16>
    %cst_11 = arith.constant dense<0.000000e+00> : vector<16x128xf32>
    %22 = tpu.matmul %20, %21, %cst_11 {dimension_numbers = #tpu.dot_dimension_numbers<[1], [0], [0], [1], [0, 0, 1, 1], [], []>} : vector<16x512xbf16>, vector<512x128xbf16>, vector<16x128xf32> -> vector<16x128xf32>
    %c0_12 = arith.constant 0 : index
    %c0_13 = arith.constant 0 : index
    %23 = vector.load %arg5[%c0_12, %c0_13] : memref<1x128xf32, #tpu.memory_space<vmem>>, vector<1x128xf32>
    %24 = vector.broadcast %23 : vector<1x128xf32> to vector<16x128xf32>
    %25 = arith.addf %22, %24 : vector<16x128xf32>
    %26 = arith.truncf %25 : vector<16x128xf32> to vector<16x128xbf16>
    %c0_14 = arith.constant 0 : index
    %c0_15 = arith.constant 0 : index
    %27 = vector.load %arg6[%c0_14, %c0_15] : memref<16x128xbf16, #tpu.memory_space<vmem>>, vector<16x128xbf16>
    tpu.vector_store %arg6[%c0_14, %c0_15], %26 {strides = array<i32>} : memref<16x128xbf16, #tpu.memory_space<vmem>>, vector<16x128xbf16>,
    return
  }
  func.func @transform_0(%arg0: i32) -> (i32, i32) {
    %c0_i32 = arith.constant 0 : i32
    %c0_i32_0 = arith.constant 0 : i32
    return %arg0, %c0_i32 : i32, i32
  }
  func.func @transform_1(%arg0: i32) -> (i32, i32) {
    %c0_i32 = arith.constant 0 : i32
    %c0_i32_0 = arith.constant 0 : i32
    %c0_i32_1 = arith.constant 0 : i32
    return %c0_i32, %c0_i32_0 : i32, i32
  }
  func.func @transform_2(%arg0: i32) -> (i32, i32) {
    %c0_i32 = arith.constant 0 : i32
    %c0_i32_0 = arith.constant 0 : i32
    %c0_i32_1 = arith.constant 0 : i32
    return %c0_i32, %c0_i32_0 : i32, i32
  }
  func.func @transform_3(%arg0: i32) -> (i32, i32) {
    %c0_i32 = arith.constant 0 : i32
    %c0_i32_0 = arith.constant 0 : i32
    %c0_i32_1 = arith.constant 0 : i32
    return %c0_i32, %c0_i32_0 : i32, i32
  }
  func.func @transform_4(%arg0: i32) -> (i32, i32) {
    %c0_i32 = arith.constant 0 : i32
    %c0_i32_0 = arith.constant 0 : i32
    %c0_i32_1 = arith.constant 0 : i32
    return %c0_i32, %c0_i32_0 : i32, i32
  }
  func.func @transform_5(%arg0: i32) -> (i32, i32) {
    %c0_i32 = arith.constant 0 : i32
    %c0_i32_0 = arith.constant 0 : i32
    return %arg0, %c0_i32 : i32, i32
  }
}

</mosaic_0001>

<bundles_post_ra>
// kernel: _mlp_forward.1
= control target key start
LH: loop header
LB: loop body
LE: loop exit
PB: predicated region body
PF: predicated region fallthrough
CT: control target
= control target key end

     0   :  { %10 = vsyncpa [#allocation3], 0  ;;  %s1147_s0 = inlined_call_operand.vmem [shape: f32[16,128], index: 0, kind: input, shape index: {}]   ;;  %s1148_s1 = inlined_call_operand.hbm [shape: bf16[128,512], index: 1, kind: input, shape index: {}]   ;;  %s1149_s2 = inlined_call_operand.vmem [shape: f32[1,512], index: 2, kind: input, shape index: {}]   ;;  %s1150_s3 = inlined_call_operand.hbm [shape: bf16[512,128], index: 3, kind: input, shape index: {}]   ;;  %s1151_s4 = inlined_call_operand.vmem [shape: f32[1,128], index: 4, kind: input, shape index: {}]   ;;  %s1152_s5 = inlined_call_operand.vmem [shape: bf16[16,128], index: 5, kind: output, shape index: {}]  }
   0x1   :  { %11 = vsyncpa [#allocation5], 0  ;;  %s1054_s18 = smov [#allocation2]  }
   0x2   :  { %s19_s19 = sshll.u32 %s1054_s18, 4  ;;  %s20_s19 = int_to_ptr.vmem [resolvable:$true] %s19_s19 }
   0x3   :  { %s1018_s20 = scalar_lea.vmem %s20_s19, 4096  ;;  %p1023_p1 = scmp.lt.s32.totalorder %s20_s19, %s20_s19 }
   0x4   :  { %p1019_p0 = scmp.ne.s32.totalorder %s20_s19, %s1018_s20  ;;  %p1024_p2 = scmp.lt.s32.totalorder %s1018_s20, %s1018_s20 }
   0x6   :  { %p1025_p3 = por %p1024_p2, %p1023_p1 }
   0x8   :  { %p1026_p4 = pnand %p1025_p3, %p1019_p0 }
   0xa   :  { %1029 = shalt.err (!%p1026_p4)
}
   0xb   :  { %s1055_s21 = smov 256   ;;  %s1056_s22 = smov 16  }
   0xc   :  { %25 = dma.hbm_to_vmem [thread:$0]  %s1148_s1, 4096, %s20_s19, [#allocation3], %s1055_s21, %s1055_s21, %s1056_s22  }
   0xd   :  { %s1057_s25 = smov [#allocation4]  }
   0xe   :  { %s33_s26 = sshll.u32 %s1057_s25, 4  ;;  %s34_s26 = int_to_ptr.vmem [resolvable:$true] %s33_s26 }
   0xf   :  { %s1038_s27 = scalar_lea.vmem %s34_s26, 4096  ;;  %p1043_p6 = scmp.lt.s32.totalorder %s34_s26, %s34_s26 }
  0x10   :  { %p1039_p5 = scmp.ne.s32.totalorder %s34_s26, %s1038_s27  ;;  %p1044_p7 = scmp.lt.s32.totalorder %s1038_s27, %s1038_s27 }
  0x12   :  { %p1045_p8 = por %p1044_p7, %p1043_p6 }
  0x14   :  { %p1046_p9 = pnand %p1045_p8, %p1039_p5 }
  0x16   :  { %1049 = shalt.err (!%p1046_p9)
}
  0x17   :  { %s1058_s28 = smov 64   ;;  %s1059_s29 = smov 4  }
  0x18   :  { %39 = dma.hbm_to_vmem [thread:$0]  %s1150_s3, 4096, %s34_s26, [#allocation5], %s1058_s28, %s1058_s28, %s1059_s29  }
  0x19   :  { %1050 = dma.done.wait [#allocation3], 4096  }
  0x1a   :  { %1051 = vsyncadd [#allocation3], 4294963200 }
  0x1b   :  { %1052 = dma.done.wait [#allocation5], 4096  }
  0x1c   :  { %1053 = vsyncadd [#allocation5], 4294963200  ;;  %v1060_v0 = vmov 0   ;;  %v914_v1 = vld [vmem:[#allocation2 + $0xe4] ss:$16 sps:$4 sm:$0xff]   ;;  %v50_v34 = vld [vmem:[%s1147_s0 + $0x8] sm:$0xff] }
  0x1d   :  { %298 = vmatprep.mubr.bf16.mxu0 %v1060_v0  ;;  %341 = vmatprep.mubr.bf16.mxu1 %v1060_v0  ;;  %v916_v2 = vld [vmem:[#allocation2 + $0xec] ss:$16 sps:$4 sm:$0xff]   ;;  %v918_v3 = vld [vmem:[#allocation2 + $0xe0] ss:$16 sps:$4 sm:$0xff]   ;;  %v919_v4 = vld [vmem:[#allocation2 + $0xe8] ss:$16 sps:$4 sm:$0xff]  }
  0x1e   :  { %266 = vmatprep.subr.bf16.mxu0 %v914_v1  ;;  %309 = vmatprep.subr.bf16.mxu1 %v916_v2  ;;  %v920_v5 = vld [vmem:[#allocation2 + $0xc4] ss:$16 sps:$4 sm:$0xff]   ;;  %v922_v6 = vld [vmem:[#allocation2 + $0xcc] ss:$16 sps:$4 sm:$0xff]   ;;  %v924_v7 = vld [vmem:[#allocation2 + $0xc0] ss:$16 sps:$4 sm:$0xff]  }
  0x1f   :  { %267 = vmatpush1.bf16.msra.mxu0 %v918_v3  ;;  %310 = vmatpush1.bf16.msra.mxu1 %v919_v4  ;;  %v925_v8 = vld [vmem:[#allocation2 + $0xc8] ss:$16 sps:$4 sm:$0xff]   ;;  %v926_v9 = vld [vmem:[#allocation2 + $0xa4] ss:$16 sps:$4 sm:$0xff]   ;;  %v928_v10 = vld [vmem:[#allocation2 + $0xac] ss:$16 sps:$4 sm:$0xff]   ;;  %v86_v4 = vlaneseq }
  0x20   :  { %268 = vmatprep.subr.bf16.mxu0 %v920_v5  ;;  %311 = vmatprep.subr.bf16.mxu1 %v922_v6  ;;  %v930_v11 = vld [vmem:[#allocation2 + $0xa0] ss:$16 sps:$4 sm:$0xff]   ;;  %v931_v12 = vld [vmem:[#allocation2 + $0xa8] ss:$16 sps:$4 sm:$0xff]   ;;  %v932_v13 = vld [vmem:[#allocation2 + $0x84] ss:$16 sps:$4 sm:$0xff]  }
  0x21   :  { %v934_v14 = vld [vmem:[#allocation2 + $0x8c] ss:$16 sps:$4 sm:$0xff]   ;;  %v936_v15 = vld [vmem:[#allocation2 + $0x80] ss:$16 sps:$4 sm:$0xff]   ;;  %v937_v16 = vld [vmem:[#allocation2 + $0x88] ss:$16 sps:$4 sm:$0xff]  }
  0x22   :  { %v938_v17 = vld [vmem:[#allocation2 + $0x64] ss:$16 sps:$4 sm:$0xff]   ;;  %v940_v18 = vld [vmem:[#allocation2 + $0x6c] ss:$16 sps:$4 sm:$0xff]   ;;  %v942_v19 = vld [vmem:[#allocation2 + $0x60] ss:$16 sps:$4 sm:$0xff]  }
  0x23   :  { %269 = vmatpush1.bf16.msra.mxu0 %v924_v7  ;;  %312 = vmatpush1.bf16.msra.mxu1 %v925_v8  ;;  %v943_v20 = vld [vmem:[#allocation2 + $0x68] ss:$16 sps:$4 sm:$0xff]   ;;  %v944_v21 = vld [vmem:[#allocation2 + $0x44] ss:$16 sps:$4 sm:$0xff]   ;;  %v946_v22 = vld [vmem:[#allocation2 + $0x4c] ss:$16 sps:$4 sm:$0xff]  }
  0x24   :  { %270 = vmatprep.subr.bf16.mxu0 %v926_v9  ;;  %313 = vmatprep.subr.bf16.mxu1 %v928_v10  ;;  %v948_v23 = vld [vmem:[#allocation2 + $0x40] ss:$16 sps:$4 sm:$0xff]   ;;  %v949_v24 = vld [vmem:[#allocation2 + $0x48] ss:$16 sps:$4 sm:$0xff]   ;;  %v950_v25 = vld [vmem:[#allocation2 + $0x24] ss:$16 sps:$4 sm:$0xff]  }
  0x25   :  { %v952_v26 = vld [vmem:[#allocation2 + $0x2c] ss:$16 sps:$4 sm:$0xff]   ;;  %v954_v27 = vld [vmem:[#allocation2 + $0x20] ss:$16 sps:$4 sm:$0xff]   ;;  %v955_v28 = vld [vmem:[#allocation2 + $0x28] ss:$16 sps:$4 sm:$0xff]  }
  0x26   :  { %v956_v29 = vld [vmem:[#allocation2 + $0x4] ss:$16 sps:$4 sm:$0xff]   ;;  %v958_v30 = vld [vmem:[#allocation2 + $0xc] ss:$16 sps:$4 sm:$0xff]   ;;  %v960_v31 = vld [vmem:[#allocation2] ss:$16 sps:$4 sm:$0xff]  }
  0x27   :  { %271 = vmatpush1.bf16.msra.mxu0 %v930_v11  ;;  %314 = vmatpush1.bf16.msra.mxu1 %v931_v12  ;;  %v961_v32 = vld [vmem:[#allocation2 + $0x8] ss:$16 sps:$4 sm:$0xff]   ;;  %v49_v33 = vld [vmem:[%s1147_s0] sm:$0xff]  ;;  %v966_v40 = vld [vmem:[#allocation4 + $0x70] sm:$0xff]   ;;  %v87_v5 = vshrl.u32 %v86_v4, 7 }
  0x28   :  { %272 = vmatprep.subr.bf16.mxu0 %v932_v13  ;;  %315 = vmatprep.subr.bf16.mxu1 %v934_v14  ;;  %v51_v35 = vpack.c.bf16 %v50_v34, %v49_v33  ;;  %v962_v36 = vld [vmem:[#allocation4 + $0x78] sm:$0xff]   ;;  %v967_v41 = vld [vmem:[#allocation4 + $0xf0] sm:$0xff]   ;;  %v970_v44 = vld [vmem:[#allocation4 + $0x68] sm:$0xff]  }
  0x29   :  { %v963_v37 = vld [vmem:[#allocation4 + $0xf8] sm:$0xff]   ;;  %v968_v42 = vld [vmem:[#allocation4 + $0x30] sm:$0xff]   ;;  %v971_v45 = vld [vmem:[#allocation4 + $0xe8] sm:$0xff]   ;;  %v88_v6 = vsub.s32 0, %v87_v5  ;;  %v96_v7 = vsub.s32 2, %v87_v5  ;;  %v92_v9 = vsub.s32 1, %v87_v5 }
  0x2a   :  { %v964_v38 = vld [vmem:[#allocation4 + $0x38] sm:$0xff]   ;;  %v969_v43 = vld [vmem:[#allocation4 + $0xb0] sm:$0xff]   ;;  %v972_v46 = vld [vmem:[#allocation4 + $0x28] sm:$0xff]   ;;  %v100_v10 = vsub.s32 3, %v87_v5 }
  0x2b   :  { %273 = vmatpush1.bf16.msra.mxu0 %v936_v15  ;;  %316 = vmatpush1.bf16.msra.mxu1 %v937_v16  ;;  %v965_v39 = vld [vmem:[#allocation4 + $0xb8] sm:$0xff]   ;;  %v973_v47 = vld [vmem:[#allocation4 + $0xa8] sm:$0xff]   ;;  %v974_v48 = vld [vmem:[#allocation4 + $0x60] sm:$0xff]  }
  0x2c   :  { %274 = vmatprep.subr.bf16.mxu0 %v938_v17  ;;  %317 = vmatprep.subr.bf16.mxu1 %v940_v18  ;;  %v975_v49 = vld [vmem:[#allocation4 + $0xe0] sm:$0xff]   ;;  %v978_v52 = vld [vmem:[#allocation4 + $0x58] sm:$0xff]   ;;  %v982_v56 = vld [vmem:[#allocation4 + $0x50] sm:$0xff]  }
  0x2d   :  { %v976_v50 = vld [vmem:[#allocation4 + $0x20] sm:$0xff]   ;;  %v979_v53 = vld [vmem:[#allocation4 + $0xd8] sm:$0xff]   ;;  %v983_v57 = vld [vmem:[#allocation4 + $0xd0] sm:$0xff]  }
  0x2e   :  { %v977_v51 = vld [vmem:[#allocation4 + $0xa0] sm:$0xff]   ;;  %v980_v54 = vld [vmem:[#allocation4 + $0x18] sm:$0xff]   ;;  %v984_v58 = vld [vmem:[#allocation4 + $0x10] sm:$0xff]  }
  0x2f   :  { %275 = vmatpush1.bf16.msra.mxu0 %v942_v19  ;;  %318 = vmatpush1.bf16.msra.mxu1 %v943_v20  ;;  %v981_v55 = vld [vmem:[#allocation4 + $0x98] sm:$0xff]   ;;  %v985_v59 = vld [vmem:[#allocation4 + $0x90] sm:$0xff]   ;;  %v986_v60 = vld [vmem:[#allocation4 + $0x48] sm:$0xff]  }
  0x30   :  { %276 = vmatprep.subr.bf16.mxu0 %v944_v21  ;;  %319 = vmatprep.subr.bf16.mxu1 %v946_v22  ;;  %v987_v61 = vld [vmem:[#allocation4 + $0xc8] sm:$0xff]   ;;  %v990_v0 = vld [vmem:[#allocation4 + $0x40] sm:$0xff]  }
  0x31   :  { %v988_v62 = vld [vmem:[#allocation4 + $0x8] sm:$0xff]   ;;  %v991_v1 = vld [vmem:[#allocation4 + $0xc0] sm:$0xff]  }
  0x32   :  { %v989_v63 = vld [vmem:[#allocation4 + $0x88] sm:$0xff]   ;;  %v992_v2 = vld [vmem:[#allocation4] sm:$0xff]  }
  0x33   :  { %277 = vmatpush1.bf16.msra.mxu0 %v948_v23  ;;  %320 = vmatpush1.bf16.msra.mxu1 %v949_v24  ;;  %v993_v3 = vld [vmem:[#allocation4 + $0x80] sm:$0xff]  }
  0x34   :  { %278 = vmatprep.subr.bf16.mxu0 %v950_v25  ;;  %321 = vmatprep.subr.bf16.mxu1 %v952_v26  ;;  %v84_v8 = vld [vmem:[%s1149_s2] sm:$0xf] }
  0x35   :  { %v89_v11 = vrot.slane %v84_v8, %v88_v6  ;;  %v97_v12 = vrot.slane %v84_v8, %v96_v7  ;;  %v93_v15 = vrot.slane %v84_v8, %v92_v9  ;;  %v101_v16 = vrot.slane %v84_v8, %v100_v10 }
  0x37   :  { %279 = vmatpush1.bf16.msra.mxu0 %v954_v27  ;;  %322 = vmatpush1.bf16.msra.mxu1 %v955_v28 }
  0x38   :  { %280 = vmatprep.subr.bf16.mxu0 %v956_v29  ;;  %323 = vmatprep.subr.bf16.mxu1 %v958_v30 }
  0x3b   :  { %281 = vmatpush1.bf16.msra.mxu0 %v960_v31  ;;  %324 = vmatpush1.bf16.msra.mxu1 %v961_v32 }
  0x3c   :  { %863 = vmatprep.subr.bf16.mxu0 %v962_v36  ;;  %885 = vmatprep.subr.bf16.mxu1 %v963_v37 }
  0x3e   :  { %299 = vmatmul.mubr.bf16.vlgmr.msra.gmra.mxu0 %v51_v35  ;;  %342 = vmatmul.mubr.bf16.vlgmr.msra.gmra.mxu1 %v51_v35 }
  0x3f   :  { %864 = vmatpush3.bf16.msra.mxu0 %v964_v38  ;;  %886 = vmatpush3.bf16.msra.mxu1 %v965_v39 }
  0x40   :  { %865 = vmatprep.subr.bf16.mxu0 %v966_v40  ;;  %887 = vmatprep.subr.bf16.mxu1 %v967_v41 }
  0x43   :  { %866 = vmatpush3.bf16.msra.mxu0 %v968_v42  ;;  %888 = vmatpush3.bf16.msra.mxu1 %v969_v43 }
  0x44   :  { %867 = vmatprep.subr.bf16.mxu0 %v970_v44  ;;  %889 = vmatprep.subr.bf16.mxu1 %v971_v45 }
  0x47   :  { %868 = vmatpush3.bf16.msra.mxu0 %v972_v46  ;;  %890 = vmatpush3.bf16.msra.mxu1 %v973_v47 }
  0x48   :  { %869 = vmatprep.subr.bf16.mxu0 %v974_v48  ;;  %891 = vmatprep.subr.bf16.mxu1 %v975_v49 }
  0x4b   :  { %870 = vmatpush3.bf16.msra.mxu0 %v976_v50  ;;  %892 = vmatpush3.bf16.msra.mxu1 %v977_v51 }
  0x4c   :  { %871 = vmatprep.subr.bf16.mxu0 %v978_v52  ;;  %893 = vmatprep.subr.bf16.mxu1 %v979_v53 }
  0x4f   :  { %872 = vmatpush3.bf16.msra.mxu0 %v980_v54  ;;  %894 = vmatpush3.bf16.msra.mxu1 %v981_v55 }
  0x50   :  { %873 = vmatprep.subr.bf16.mxu0 %v982_v56  ;;  %895 = vmatprep.subr.bf16.mxu1 %v983_v57 }
  0x53   :  { %874 = vmatpush3.bf16.msra.mxu0 %v984_v58  ;;  %896 = vmatpush3.bf16.msra.mxu1 %v985_v59 }
  0x54   :  { %875 = vmatprep.subr.bf16.mxu0 %v986_v60  ;;  %897 = vmatprep.subr.bf16.mxu1 %v987_v61 }
  0x57   :  { %876 = vmatpush3.bf16.msra.mxu0 %v988_v62  ;;  %898 = vmatpush3.bf16.msra.mxu1 %v989_v63 }
  0x58   :  { %877 = vmatprep.subr.bf16.mxu0 %v990_v0  ;;  %899 = vmatprep.subr.bf16.mxu1 %v991_v1 }
  0x5b   :  { %878 = vmatpush3.bf16.msra.mxu0 %v992_v2  ;;  %900 = vmatpush3.bf16.msra.mxu1 %v993_v3 }
  0xfe   :  { %v300_v13 = vpop.f32.mrf.mxu0  ;;  %v343_v14 = vpop.f32.mrf.mxu1 }
  0xff   :  { %v1106_v17 = vadd.f32 %v300_v13, %v89_v11  ;;  %v1108_v18 = vadd.f32 %v343_v14, %v97_v12 }
 0x100   :  { %v302_v19 = vpop.f32.mrf.mxu0  ;;  %v345_v20 = vpop.f32.mrf.mxu1 }
 0x101   :  { %v360_v21 = vmul.f32 %v1106_v17, %v1106_v17  ;;  %v362_v22 = vmul.f32 %v1108_v18, %v1108_v18  ;;  %v1114_v23 = vadd.f32 %v302_v19, %v93_v15  ;;  %v1116_v24 = vadd.f32 %v345_v20, %v101_v16 }
 0x102   :  { %v304_v25 = vpop.f32.mrf.mxu0  ;;  %v347_v26 = vpop.f32.mrf.mxu1 }
 0x103   :  { %v368_v27 = vmul.f32 %v360_v21, %v1106_v17  ;;  %v370_v28 = vmul.f32 %v362_v22, %v1108_v18  ;;  %v305_v29 = vadd.f32 %v304_v25, %v89_v11  ;;  %v1120_v30 = vadd.f32 %v347_v26, %v97_v12 }
 0x104   :  { %v361_v31 = vmul.f32 %v1114_v23, %v1114_v23  ;;  %v363_v32 = vmul.f32 %v1116_v24, %v1116_v24  ;;  %v306_v33 = vpop.f32.mrf.mxu0  ;;  %v349_v37 = vpop.f32.mrf.mxu1  ;;  %v353_v22 = vmul.f32 0.5, %v1114_v23 }
 0x105   :  { %v376_v34 = vmul.f32 0.044715, %v368_v27  ;;  %v378_v35 = vmul.f32 0.044715, %v370_v28  ;;  %v364_v36 = vmul.f32 %v305_v29, %v305_v29  ;;  %v366_v40 = vmul.f32 %v1120_v30, %v1120_v30 }
 0x106   :  { %v369_v38 = vmul.f32 %v361_v31, %v1114_v23  ;;  %v371_v39 = vmul.f32 %v363_v32, %v1116_v24  ;;  %v307_v43 = vadd.f32 %v306_v33, %v93_v15  ;;  %v350_v47 = vadd.f32 %v349_v37, %v101_v16 }
 0x107   :  { %v384_v41 = vadd.f32 %v376_v34, %v1106_v17  ;;  %v372_v42 = vmul.f32 %v364_v36, %v305_v29  ;;  %v374_v46 = vmul.f32 %v366_v40, %v1120_v30  ;;  %v386_v49 = vadd.f32 %v378_v35, %v1108_v18 }
 0x108   :  { %v377_v44 = vmul.f32 0.044715, %v369_v38  ;;  %v379_v45 = vmul.f32 0.044715, %v371_v39  ;;  %v365_v51 = vmul.f32 %v307_v43, %v307_v43  ;;  %v367_v55 = vmul.f32 %v350_v47, %v350_v47 }
 0x109   :  { %v392_v48 = vmul.f32 0.7978846, %v384_v41  ;;  %v380_v50 = vmul.f32 0.044715, %v372_v42  ;;  %v382_v54 = vmul.f32 0.044715, %v374_v46 }
 0x10a   :  { %v385_v52 = vadd.f32 %v377_v44, %v1114_v23  ;;  %v387_v53 = vadd.f32 %v379_v45, %v1116_v24  ;;  %v373_v57 = vmul.f32 %v365_v51, %v307_v43  ;;  %v375_v63 = vmul.f32 %v367_v55, %v350_v47 }
 0x10b   :  { %v388_v56 = vadd.f32 %v380_v50, %v305_v29  ;;  %v390_v60 = vadd.f32 %v382_v54, %v1120_v30  ;;  %994 = vtanh.f32 %v392_v48  ;;  %v394_v0 = vmul.f32 0.7978846, %v386_v49 }
 0x10c   :  { %v393_v58 = vmul.f32 0.7978846, %v385_v52  ;;  %v395_v59 = vmul.f32 0.7978846, %v387_v53  ;;  %v381_v62 = vmul.f32 0.044715, %v373_v57 }
 0x10d   :  { %v396_v61 = vmul.f32 0.7978846, %v388_v56  ;;  %v398_v1 = vmul.f32 0.7978846, %v390_v60  ;;  %v383_v3 = vmul.f32 0.044715, %v375_v63 }
 0x10e   :  { %996 = vtanh.f32 %v393_v58  ;;  %v389_v2 = vadd.f32 %v381_v62, %v307_v43  ;;  %v352_v16 = vmul.f32 0.5, %v1106_v17  ;;  %v356_v19 = vmul.f32 0.5, %v305_v29 }
 0x10f   :  { %998 = vtanh.f32 %v395_v59  ;;  %v391_v5 = vadd.f32 %v383_v3, %v350_v47  ;;  %v357_v25 = vmul.f32 0.5, %v307_v43  ;;  %v358_v31 = vmul.f32 0.5, %v1120_v30 }
 0x110   :  { %1000 = vtanh.f32 %v396_v61  ;;  %v397_v4 = vmul.f32 0.7978846, %v389_v2  ;;  %v355_v32 = vmul.f32 0.5, %v1116_v24  ;;  %v359_v37 = vmul.f32 0.5, %v350_v47 }
 0x111   :  { %1002 = vtanh.f32 %v398_v1  ;;  %v399_v6 = vmul.f32 0.7978846, %v391_v5  ;;  %v354_v17 = vmul.f32 0.5, %v1108_v18  ;;  %v821_v18 = vld [vmem:[%s1151_s4] ss:$0 sm:$0xff] }
 0x112   :  { %1004 = vtanh.f32 %v394_v0 }
 0x113   :  { %1006 = vtanh.f32 %v397_v4 }
 0x114   :  { %1008 = vtanh.f32 %v399_v6 }
 0x118   :  { %v995_v7 = vpop.eup %994 }
 0x119   :  { %v408_v20 = vadd.f32 1.0, %v995_v7 }
 0x11b   :  { %v997_v8 = vpop.eup %996  ;;  %v416_v29 = vmul.f32 %v408_v20, %v352_v16 }
 0x11c   :  { %v999_v9 = vpop.eup %998  ;;  %v409_v14 = vadd.f32 1.0, %v997_v8 }
 0x11d   :  { %v1001_v10 = vpop.eup %1000  ;;  %v411_v27 = vadd.f32 1.0, %v999_v9 }
 0x11e   :  { %v1003_v11 = vpop.eup %1002  ;;  %v412_v12 = vadd.f32 1.0, %v1001_v10  ;;  %v417_v35 = vmul.f32 %v409_v14, %v353_v22 }
 0x11f   :  { %v1005_v13 = vpop.eup %1004  ;;  %v414_v21 = vadd.f32 1.0, %v1003_v11  ;;  %v419_v23 = vmul.f32 %v411_v27, %v355_v32 }
 0x120   :  { %v1007_v15 = vpop.eup %1006  ;;  %v420_v33 = vmul.f32 %v412_v12, %v356_v19  ;;  %v410_v34 = vadd.f32 1.0, %v1005_v13 }
 0x121   :  { %v413_v26 = vadd.f32 1.0, %v1007_v15  ;;  %v1009_v28 = vpop.eup %1008  ;;  %v422_v39 = vmul.f32 %v414_v21, %v358_v31 }
 0x122   :  { %v415_v38 = vadd.f32 1.0, %v1009_v28  ;;  %v424_v42 = vpack.c.bf16 %v420_v33, %v416_v29  ;;  %v418_v43 = vmul.f32 %v410_v34, %v354_v17 }
 0x123   :  { %v421_v36 = vmul.f32 %v413_v26, %v357_v25 }
 0x124   :  { %v423_v41 = vmul.f32 %v415_v38, %v359_v37  ;;  %v426_v30 = vpack.c.bf16 %v422_v39, %v418_v43 }
 0x125   :  { %v425_v40 = vpack.c.bf16 %v421_v36, %v417_v35 }
 0x126   :  { %v427_v44 = vpack.c.bf16 %v423_v41, %v419_v23 }
 0x127   :  { %723 = vmatprep.mubr.bf16.mxu0 %v425_v40 }
 0x128   :  { %724 = vmatmul.mubr.bf16.vlgmr.msra.gmra.mxu0 %v424_v42  ;;  %764 = vmatprep.mubr.bf16.mxu1 %v427_v44 }
 0x129   :  { %765 = vmatmul.mubr.bf16.vlgmr.msra.gmra.mxu1 %v426_v30 }
 0x1e8   :  { %v879_v24 = vpop.f32.mrf.mxu0 }
 0x1e9   :  { %v901_v45 = vpop.f32.mrf.mxu1 }
 0x1ea   :  { %v880_v46 = vpop.f32.mrf.mxu0 }
 0x1eb   :  { %v881_v47 = vadd.f32 %v880_v46, %v879_v24  ;;  %v902_v48 = vpop.f32.mrf.mxu1 }
 0x1ec   :  { %v882_v49 = vpop.f32.mrf.mxu0  ;;  %v903_v55 = vadd.f32 %v902_v48, %v901_v45 }
 0x1ed   :  { %v904_v50 = vpop.f32.mrf.mxu1  ;;  %v726_v52 = vadd.f32 %v881_v47, %v821_v18 }
 0x1ee   :  { %v883_v51 = vpop.f32.mrf.mxu0 }
 0x1ef   :  { %v884_v53 = vadd.f32 %v883_v51, %v882_v49  ;;  %v905_v54 = vpop.f32.mrf.mxu1  ;;  %v767_v58 = vadd.f32 %v903_v55, %v726_v52 }
 0x1f0   :  { %v906_v57 = vadd.f32 %v905_v54, %v904_v50 }
 0x1f1   :  { %v729_v56 = vadd.f32 %v884_v53, %v821_v18 }
 0x1f3   :  { %v770_v59 = vadd.f32 %v906_v57, %v729_v56 }
 0x1f5   :  { %v861_v60 = vpack.c.bf16 %v770_v59, %v767_v58 }
 0x1f7   :  { %862 = vst [vmem:[%s1152_s5] sm:$0xff] %v861_v60  }
 0x1f8   :  { %787 = vsyncpa [#allocation3], 1 }
 0x1f9   :  { %788 = vsyncpa [#allocation5], 1 }

</bundles_post_ra>
